<compile_context>
chip_gen: v6e
topology: v6e:2x2x1
jax: 0.10.0
libtpu: 0.0.40
codegen_flags: <defaults>
</compile_context>

<pallas_src>
import functools

import numpy as np
import jax
import jax.numpy as jnp
from jax.experimental import pallas as pl
from jax.experimental.pallas import tpu as pltpu


_BLOCK_KEYS = ("ln1_g", "ln1_b", "wqkv", "bqkv", "wo", "bo",
               "ln2_g", "ln2_b", "w1", "b1", "w2", "b2")


@functools.lru_cache(maxsize=1)
def _vmem_limit_bytes():
    """~70% of physical VMEM: headroom for compiler scratch + pipeline buffers."""
    try:
        cap = int(pltpu.get_tpu_info().vmem_capacity_bytes)
    except Exception:
        cap = 64 * 1024 * 1024
    return int(cap * 0.70)


# ----------------------------- in-kernel helpers ----------------------------


def _ln(x, g, b, eps):
    """LayerNorm over the last dim. x:(M,D) f32, g/b:(1,D)."""
    mu = jnp.mean(x, axis=-1, keepdims=True)
    var = jnp.mean(jnp.square(x - mu), axis=-1, keepdims=True)
    return (x - mu) * jax.lax.rsqrt(var + eps) * g + b


# ----------------------------- Pallas kernels ------------------------------


def _patch_embed_kernel(x_ref, w_ref, b_ref, pos_ref, o_ref):
    # patch_embed Conv1d(k=stride=patch) == per-patch matmul; pos_embed fused in.
    # Whole batch in one call: M = B*P rows feed the MXU (no 1-row grid steps).
    B, P, ps = x_ref.shape
    D = w_ref.shape[1]
    cdt = w_ref.dtype
    x = x_ref[...].reshape(B * P, ps).astype(cdt)
    tok = jnp.dot(x, w_ref[...], preferred_element_type=jnp.float32)
    tok = tok.reshape(B, P, D) + b_ref[...] + pos_ref[...]
    o_ref[...] = tok.astype(o_ref.dtype)


def _blocks_kernel(tok_in, ln1g, ln1b, wqkv, bqkv, wo, bo,
                   ln2g, ln2b, w1, b1, w2, b2, o_ref, *, num_heads, eps):
    """All transformer blocks fused: grid=(B, depth), depth innermost/"arbitrary".

    The residual stream lives in the revisited output block (resident in VMEM
    across the whole depth loop); per-block weights stream in via the depth index.
    """
    @pl.when(pl.program_id(1) == 0)
    def _():
        o_ref[...] = tok_in[...]

    tok = o_ref[0].astype(jnp.float32)                 # (S, D) residual stream
    S, D = tok.shape
    H = num_heads
    Dh = D // H
    scale = Dh ** -0.5
    cdt = wqkv.dtype                                   # MXU compute dtype (bf16)

    # ---- LN1 + fused QKV (single (S,D)@(D,3D) matmul) + MHSA + residual ----
    h = _ln(tok, ln1g[0], ln1b[0], eps).astype(cdt)
    qkv = jnp.dot(h, wqkv[0], preferred_element_type=jnp.float32) + bqkv[0]  # (S, 3D) f32

    def heads(t):
        # packed last-dim layout is [3][H][Dh]; static lane slices -> (H, S, Dh)
        return jnp.stack(
            [qkv[:, (t * H + hh) * Dh:(t * H + hh + 1) * Dh] for hh in range(H)],
            axis=0)

    q, k, v = heads(0), heads(1), heads(2)

    att = jnp.einsum("hqe,hke->hqk", q.astype(cdt), k.astype(cdt),
                     preferred_element_type=jnp.float32) * scale    # (H, S, S)
    att = att - jnp.max(att, axis=-1, keepdims=True)
    p = jnp.exp(att)
    p = p * pl.reciprocal(jnp.sum(p, axis=-1, keepdims=True), approx=True)

    ao = jnp.einsum("hqk,hke->hqe", p.astype(cdt), v.astype(cdt),
                    preferred_element_type=jnp.float32)             # (H, S, Dh)
    cat = jnp.concatenate([ao[hh] for hh in range(H)], axis=-1)     # (S, H*Dh)
    tok = tok + jnp.dot(cat.astype(cdt), wo[0],
                        preferred_element_type=jnp.float32) + bo[0]

    # ---- LN2 + MLP + residual ----------------------------------------------
    # TODO(synk): at production (D=1024, hidden=4096) add a K-tiled grid axis with
    # an f32 accumulator so w1/w2 slices stay within the v7x/v5e VMEM budget.
    h2 = _ln(tok, ln2g[0], ln2b[0], eps).astype(cdt)
    mid = jnp.dot(h2, w1[0], preferred_element_type=jnp.float32) + b1[0]
    mid = jax.nn.gelu(mid, approximate=False)   # exact erf == torch nn.GELU()
    tok = tok + jnp.dot(mid.astype(cdt), w2[0],
                        preferred_element_type=jnp.float32) + b2[0]

    o_ref[0] = tok.astype(o_ref.dtype)


def _head_kernel(tok_ref, ng, nb, cm1w, cm1b, cm2w, cm2b, dw, db, o_ref, *, eps):
    """Final LayerNorm + channel_mapper (1x1 convs, weight-on-left) + dim_mapper.

    D stays the lane dim the whole way; final output lane dim is cond_dim.
    """
    cdt = dw.dtype
    tok = tok_ref[0].astype(jnp.float32)                  # (S, D)
    lat = _ln(tok, ng[...], nb[...], eps).astype(cdt)     # (S, D)
    t = jnp.dot(cm1w[...], lat, preferred_element_type=jnp.float32) + cm1b[...]
    t = jnp.dot(cm2w[...], t.astype(cdt),
                preferred_element_type=jnp.float32) + cm2b[...]
    out = jnp.dot(t.astype(cdt), dw[...],
                  preferred_element_type=jnp.float32) + db[...]
    o_ref[0] = out.astype(o_ref.dtype)                    # (77, cond_dim)


def _head_gp_kernel(tok_ref, ng, nb, dw, db, o_ref, *, eps):
    """global_pool path: mean over tokens + LayerNorm + dim_mapper (whole batch)."""
    cdt = dw.dtype
    tok = tok_ref[...].astype(jnp.float32)                # (B, S, D)
    pooled = jnp.mean(tok, axis=1)                        # (B, D)
    lat = _ln(pooled, ng[...], nb[...], eps).astype(cdt)
    out = jnp.dot(lat, dw[...], preferred_element_type=jnp.float32) + db[...]
    o_ref[...] = out.reshape(o_ref.shape).astype(o_ref.dtype)   # (B, 1, cond)


# ------------------------------ kernel wrappers ------------------------------


def patch_embed(x, w, b, pos):
    """x: (B, P, ps); w: (ps, D) bf16; b: (1,1,D); pos: (1, P, D) -> (B, P, D)."""
    B, P, ps = x.shape
    D = w.shape[1]
    return pl.pallas_call(
        _patch_embed_kernel,
        out_shape=jax.ShapeDtypeStruct((B, P, D), x.dtype),
        compiler_params=pltpu.CompilerParams(vmem_limit_bytes=_vmem_limit_bytes()),
    )(x, w, b, pos)


def transformer_blocks(tok, blocks, *, num_heads, eps=1e-6):
    """All blocks in one pallas_call: grid=(B, depth), tok resident across depth."""
    B, S, D = tok.shape

    def wspec(arr):
        zeros = (0,) * (arr.ndim - 1)
        return pl.BlockSpec((1,) + arr.shape[1:], lambda b, l, z=zeros: (l,) + z)

    return pl.pallas_call(
        functools.partial(_blocks_kernel, num_heads=num_heads, eps=eps),
        out_shape=jax.ShapeDtypeStruct((B, S, D), tok.dtype),
        grid=(B, blocks["wqkv"].shape[0]),
        in_specs=[pl.BlockSpec((1, S, D), lambda b, l: (b, 0, 0))]
                 + [wspec(blocks[k]) for k in _BLOCK_KEYS],
        out_specs=pl.BlockSpec((1, S, D), lambda b, l: (b, 0, 0)),
        compiler_params=pltpu.CompilerParams(
            # NOTE: for B == 1 on v7x, split S into a second "parallel" axis to
            # keep both TensorCores busy (not needed at these shapes).
            dimension_semantics=("parallel", "arbitrary"),
            vmem_limit_bytes=_vmem_limit_bytes(),
        ),
    )(tok, *(blocks[k] for k in _BLOCK_KEYS))


def encoder_head(tok, params, eps=1e-6):
    """Final norm + channel_mapper + dim_mapper (global_pool=False)."""
    B, S, D = tok.shape
    cond = params["dim_w"].shape[1]
    S2 = params["cm1_w"].shape[0]
    C_out = params["cm2_w"].shape[0]                      # 77
    return pl.pallas_call(
        functools.partial(_head_kernel, eps=eps),
        out_shape=jax.ShapeDtypeStruct((B, C_out, cond), tok.dtype),
        grid=(B,),
        in_specs=[
            pl.BlockSpec((1, S, D), lambda i: (i, 0, 0)),
            pl.BlockSpec((1, D), lambda i: (0, 0)),
            pl.BlockSpec((1, D), lambda i: (0, 0)),
            pl.BlockSpec((S2, S), lambda i: (0, 0)),
            pl.BlockSpec((S2, 1), lambda i: (0, 0)),
            pl.BlockSpec((C_out, S2), lambda i: (0, 0)),
            pl.BlockSpec((C_out, 1), lambda i: (0, 0)),
            pl.BlockSpec((D, cond), lambda i: (0, 0)),
            pl.BlockSpec((1, cond), lambda i: (0, 0)),
        ],
        out_specs=pl.BlockSpec((1, C_out, cond), lambda i: (i, 0, 0)),
        compiler_params=pltpu.CompilerParams(
            dimension_semantics=("parallel",),
            vmem_limit_bytes=_vmem_limit_bytes(),
        ),
    )(tok,
      params["norm_g"], params["norm_b"],
      params["cm1_w"], params["cm1_b"],
      params["cm2_w"], params["cm2_b"],
      params["dim_w"], params["dim_b"])


def encoder_head_global_pool(tok, params, eps=1e-6):
    """Final mean-pool + norm + dim_mapper (global_pool=True), whole batch at once."""
    B, S, D = tok.shape
    cond = params["dim_w"].shape[1]
    return pl.pallas_call(
        functools.partial(_head_gp_kernel, eps=eps),
        out_shape=jax.ShapeDtypeStruct((B, 1, cond), tok.dtype),
        compiler_params=pltpu.CompilerParams(vmem_limit_bytes=_vmem_limit_bytes()),
    )(tok, params["norm_g"], params["norm_b"], params["dim_w"], params["dim_b"])


# ------------------------------ model params -------------------------------


def init_params(key, *, num_voxels, patch_size, embed_dim, depth, num_heads,
                mlp_ratio, cond_dim, global_pool, compute_dtype=jnp.bfloat16):
    P = num_voxels // patch_size
    hidden = int(embed_dim * mlp_ratio)
    D = embed_dim
    assert D % num_heads == 0
    keys = iter(jax.random.split(key, 64))

    def nrm(shape, dtype=jnp.float32, scale=0.02):
        return (scale * jax.random.normal(next(keys), shape)).astype(dtype)

    params = {
        # patch_embed: Conv1d(1, D, k=patch, stride=patch) as (patch, D) matmul
        "patch_embed_w": nrm((patch_size, D), compute_dtype, scale=patch_size ** -0.5),
        "patch_embed_b": nrm((1, 1, D)),
        "pos_embed": nrm((1, P, D)),
        "norm_g": jnp.ones((1, D), jnp.float32),
        "norm_b": jnp.zeros((1, D), jnp.float32),
        # dim_mapper: Linear(D, cond_dim)
        "dim_w": nrm((D, cond_dim), compute_dtype, scale=0.2),
        "dim_b": nrm((1, cond_dim)),
        # per-block weights stacked on a leading depth axis (streamed by the grid)
        "blocks": {
            "ln1_g": jnp.ones((depth, 1, D), jnp.float32),
            "ln1_b": jnp.zeros((depth, 1, D), jnp.float32),
            # fused qkv: last dim packed [3][num_heads][Dh] (timm layout)
            "wqkv": nrm((depth, D, 3 * D), compute_dtype),
            "bqkv": nrm((depth, 1, 3 * D)),
            # out proj: rows packed [num_heads][Dh]
            "wo": nrm((depth, D, D), compute_dtype),
            "bo": nrm((depth, 1, D)),
            "ln2_g": jnp.ones((depth, 1, D), jnp.float32),
            "ln2_b": jnp.zeros((depth, 1, D), jnp.float32),
            "w1": nrm((depth, D, hidden), compute_dtype),
            "b1": nrm((depth, 1, hidden)),
            "w2": nrm((depth, hidden, D), compute_dtype),
            "b2": nrm((depth, 1, D)),
        },
    }
    if not global_pool:
        # channel_mapper 1x1 convs stored (out_ch, in_ch) for weight-on-left matmul
        params["cm1_w"] = nrm((P // 2, P), compute_dtype, scale=0.2)
        params["cm1_b"] = nrm((P // 2, 1))
        params["cm2_w"] = nrm((77, P // 2), compute_dtype, scale=0.2)
        params["cm2_b"] = nrm((77, 1))
    return params


# ------------------------------ forward pass -------------------------------


def forward(params, x, *, num_heads, global_pool):
    """cond_stage_model.forward — Pallas-backed."""
    if x.ndim == 4:
        x = jnp.squeeze(x, axis=1)                 # (B, 1, V)
    B = x.shape[0]
    V = x.shape[-1]
    ps, D = params["patch_embed_w"].shape
    P = V // ps

    # patch_embed (+ pos_embed fused) — single whole-array kernel
    xp = x.reshape(B, P, ps)
    tok = patch_embed(xp, params["patch_embed_w"], params["patch_embed_b"],
                      params["pos_embed"])

    # all transformer blocks — ONE fused pallas_call, tok resident across depth
    tok = transformer_blocks(tok, params["blocks"], num_heads=num_heads)

    if global_pool:
        return encoder_head_global_pool(tok, params)
    return encoder_head(tok, params)


def reference_forward(params, x, *, num_heads, global_pool, eps=1e-6):
    """Pure-JAX reference with identical bf16 matmul casting for validation."""
    cdt = params["patch_embed_w"].dtype
    f32 = jnp.float32
    if x.ndim == 4:
        x = jnp.squeeze(x, axis=1)
    B = x.shape[0]
    ps, D = params["patch_embed_w"].shape
    V = x.shape[-1]
    P = V // ps
    H = num_heads
    Dh = D // H
    scale = Dh ** -0.5

    def ln(y, g, b):
        mu = jnp.mean(y, -1, keepdims=True)
        var = jnp.mean((y - mu) ** 2, -1, keepdims=True)
        return (y - mu) * jax.lax.rsqrt(var + eps) * g + b

    xp = x.reshape(B, P, ps).astype(cdt)
    tok = (jnp.einsum("bps,sd->bpd", xp, params["patch_embed_w"],
                      preferred_element_type=f32)
           + params["patch_embed_b"] + params["pos_embed"])

    blk = params["blocks"]
    depth = blk["wqkv"].shape[0]
    for l in range(depth):
        h = ln(tok, blk["ln1_g"][l], blk["ln1_b"][l])
        qkv = (jnp.einsum("bsd,de->bse", h.astype(cdt), blk["wqkv"][l],
                          preferred_element_type=f32) + blk["bqkv"][l])
        qkv = qkv.reshape(B, P, 3, H, Dh)
        q = jnp.transpose(qkv[:, :, 0], (0, 2, 1, 3))      # (B, H, S, Dh)
        k = jnp.transpose(qkv[:, :, 1], (0, 2, 1, 3))
        v = jnp.transpose(qkv[:, :, 2], (0, 2, 1, 3))
        att = jnp.einsum("bhqe,bhke->bhqk", q.astype(cdt), k.astype(cdt),
                         preferred_element_type=f32) * scale
        p = jax.nn.softmax(att, axis=-1)
        ao = jnp.einsum("bhqk,bhke->bhqe", p.astype(cdt), v.astype(cdt),
                        preferred_element_type=f32)
        ao = jnp.transpose(ao, (0, 2, 1, 3)).reshape(B, P, H * Dh)
        tok = tok + (jnp.einsum("bse,ed->bsd", ao.astype(cdt), blk["wo"][l],
                                preferred_element_type=f32) + blk["bo"][l])
        h2 = ln(tok, blk["ln2_g"][l], blk["ln2_b"][l])
        mid = (jnp.einsum("bsd,dh->bsh", h2.astype(cdt), blk["w1"][l],
                          preferred_element_type=f32) + blk["b1"][l])
        mid = jax.nn.gelu(mid, approximate=False)
        tok = tok + (jnp.einsum("bsh,hd->bsd", mid.astype(cdt), blk["w2"][l],
                                preferred_element_type=f32) + blk["b2"][l])

    if global_pool:
        tok = jnp.mean(tok, axis=1, keepdims=True)
    lat = ln(tok, params["norm_g"], params["norm_b"])
    if not global_pool:
        lat = (jnp.einsum("os,bsd->bod", params["cm1_w"], lat.astype(cdt),
                          preferred_element_type=f32)
               + params["cm1_b"][None])
        lat = (jnp.einsum("os,bsd->bod", params["cm2_w"], lat.astype(cdt),
                          preferred_element_type=f32)
               + params["cm2_b"][None])
    return (jnp.einsum("bod,dc->boc", lat.astype(cdt), params["dim_w"],
                       preferred_element_type=f32) + params["dim_b"])


# ---------------------------------- main ------------------------------------


if __name__ == "__main__":
    B = 2
    num_voxels = 128
    patch_size = 16          # -> num_patches (fmri_seq_len) = 8
    embed_dim = 32           # fmri_latent_dim
    depth = 2
    num_heads = 4
    mlp_ratio = 1.0
    cond_dim = 128           # small stand-in for 1280
    global_pool = False      # exercises the channel_mapper path

    key = jax.random.PRNGKey(0)
    pkey, xkey = jax.random.split(key)
    params = init_params(
        pkey,
        num_voxels=num_voxels, patch_size=patch_size, embed_dim=embed_dim,
        depth=depth, num_heads=num_heads, mlp_ratio=mlp_ratio,
        cond_dim=cond_dim, global_pool=global_pool,
    )
    # input fMRI: (B, 1, 1, num_voxels); forward squeezes dim 1 like the module
    x = jax.random.normal(xkey, (B, 1, 1, num_voxels), jnp.float32)

    out = forward(params, x, num_heads=num_heads, global_pool=global_pool)
    out = jax.block_until_ready(out)

    expected_seq = 1 if global_pool else 77
    assert out.shape == (B, expected_seq, cond_dim), out.shape

    ref = reference_forward(params, x, num_heads=num_heads, global_pool=global_pool)
    np.testing.assert_allclose(np.asarray(out, dtype=np.float32),
                               np.asarray(ref, dtype=np.float32),
                               atol=2e-3, rtol=2e-3)

    print("KERNEL_OK")
</pallas_src>

<mosaic_0001>
module attributes {stable_mosaic.version = 11 : i64} {
  func.func @_patch_embed_kernel(%arg0: memref<2x8x16xf32, #tpu.memory_space<vmem>>, %arg1: memref<16x32xbf16, #tpu.memory_space<vmem>>, %arg2: memref<1x1x32xf32, #tpu.memory_space<vmem>>, %arg3: memref<1x8x32xf32, #tpu.memory_space<vmem>>, %arg4: memref<2x8x32xf32, #tpu.memory_space<vmem>>) attributes {dimension_semantics = [], scalar_prefetch = 0 : i64, scratch_operands = 0 : i64, tpu.core_type = #tpu.core_type<tc>} {
    %c0 = arith.constant 0 : index
    %c0_0 = arith.constant 0 : index
    %c0_1 = arith.constant 0 : index
    %0 = vector.load %arg0[%c0, %c0_0, %c0_1] : memref<2x8x16xf32, #tpu.memory_space<vmem>>, vector<2x8x16xf32>
    %1 = vector.shape_cast %0 : vector<2x8x16xf32> to vector<16x16xf32>
    %2 = arith.truncf %1 : vector<16x16xf32> to vector<16x16xbf16>
    %c0_2 = arith.constant 0 : index
    %c0_3 = arith.constant 0 : index
    %3 = vector.load %arg1[%c0_2, %c0_3] : memref<16x32xbf16, #tpu.memory_space<vmem>>, vector<16x32xbf16>
    %cst = arith.constant dense<0.000000e+00> : vector<16x32xf32>
    %4 = tpu.matmul %2, %3, %cst {dimension_numbers = #tpu.dot_dimension_numbers<[1], [0], [0], [1], [0, 0, 1, 1], [], []>} : vector<16x16xbf16>, vector<16x32xbf16>, vector<16x32xf32> -> vector<16x32xf32>
    %5 = vector.shape_cast %4 : vector<16x32xf32> to vector<2x8x32xf32>
    %c0_4 = arith.constant 0 : index
    %c0_5 = arith.constant 0 : index
    %c0_6 = arith.constant 0 : index
    %6 = vector.load %arg2[%c0_4, %c0_5, %c0_6] : memref<1x1x32xf32, #tpu.memory_space<vmem>>, vector<1x1x32xf32>
    %7 = vector.broadcast %6 : vector<1x1x32xf32> to vector<2x8x32xf32>
    %8 = arith.addf %5, %7 : vector<2x8x32xf32>
    %c0_7 = arith.constant 0 : index
    %c0_8 = arith.constant 0 : index
    %c0_9 = arith.constant 0 : index
    %9 = vector.load %arg3[%c0_7, %c0_8, %c0_9] : memref<1x8x32xf32, #tpu.memory_space<vmem>>, vector<1x8x32xf32>
    %10 = vector.broadcast %9 : vector<1x8x32xf32> to vector<2x8x32xf32>
    %11 = arith.addf %8, %10 : vector<2x8x32xf32>
    %c0_10 = arith.constant 0 : index
    %c0_11 = arith.constant 0 : index
    %c0_12 = arith.constant 0 : index
    %12 = vector.load %arg4[%c0_10, %c0_11, %c0_12] : memref<2x8x32xf32, #tpu.memory_space<vmem>>, vector<2x8x32xf32>
    tpu.vector_store %arg4[%c0_10, %c0_11, %c0_12], %11 {strides = array<i32>} : memref<2x8x32xf32, #tpu.memory_space<vmem>>, vector<2x8x32xf32>,
    return
  }
}

</mosaic_0001>

<bundles_post_ra>
// kernel: tpu_custom_call.1
= control target key start
LH: loop header
LB: loop body
LE: loop exit
PB: predicated region body
PF: predicated region fallthrough
CT: control target
= control target key end

     0   :  { %9 = vsyncpa [#allocation3], 0  ;;  %s311_s0 = inlined_call_operand.hbm [shape: f32[2,8,16], index: 0, kind: input, shape index: {}]   ;;  %s312_s1 = inlined_call_operand.hbm [shape: bf16[16,32], index: 1, kind: input, shape index: {}]   ;;  %s313_s2 = inlined_call_operand.vmem [shape: f32[1,1,32], index: 2, kind: input, shape index: {}]   ;;  %s314_s3 = inlined_call_operand.hbm [shape: f32[1,8,32], index: 3, kind: input, shape index: {}]   ;;  %s315_s4 = inlined_call_operand.hbm [shape: f32[2,8,32], index: 4, kind: output, shape index: {}]  }
   0x1   :  { %10 = vsyncpa [#allocation6], 0 }
   0x2   :  { %11 = vsyncpa [#allocation4], 0  ;;  %s255_s15 = smov [#allocation5]  }
   0x3   :  { %s29_s16 = sshll.u32 %s255_s15, 4  ;;  %s30_s16 = int_to_ptr.vmem [resolvable:$true] %s29_s16 }
   0x4   :  { %s177_s17 = scalar_lea.vmem %s30_s16, 128  ;;  %p182_p1 = scmp.lt.s32.totalorder %s30_s16, %s30_s16 }
   0x5   :  { %p178_p0 = scmp.ne.s32.totalorder %s30_s16, %s177_s17  ;;  %p183_p2 = scmp.lt.s32.totalorder %s177_s17, %s177_s17 }
   0x7   :  { %p184_p3 = por %p183_p2, %p182_p1 }
   0x9   :  { %p185_p4 = pnand %p184_p3, %p178_p0 }
   0xb   :  { %188 = shalt.err (!%p185_p4)
}
   0xc   :  { %s256_s18 = smov 64   ;;  %s257_s19 = smov 4  }
   0xd   :  { %35 = dma.hbm_to_vmem [thread:$0]  %s312_s1, 128, %s30_s16, [#allocation6], %s256_s18, %s256_s18, %s257_s19  }
   0xe   :  { %s258_s22 = smov [#allocation2]  }
   0xf   :  { %s17_s23 = sshll.u32 %s258_s22, 4  ;;  %s18_s23 = int_to_ptr.vmem [resolvable:$true] %s17_s23 }
  0x10   :  { %s197_s24 = scalar_lea.vmem %s18_s23, 256  ;;  %p202_p6 = scmp.lt.s32.totalorder %s18_s23, %s18_s23 }
  0x11   :  { %p198_p5 = scmp.ne.s32.totalorder %s18_s23, %s197_s24  ;;  %p203_p7 = scmp.lt.s32.totalorder %s197_s24, %s197_s24 }
  0x13   :  { %p204_p8 = por %p203_p7, %p202_p6 }
  0x15   :  { %p205_p9 = pnand %p204_p8, %p198_p5 }
  0x17   :  { %208 = shalt.err (!%p205_p9)
}
  0x18   :  { %s259_s25 = smov 128   ;;  %s260_s26 = smov 8  }
  0x19   :  { %23 = dma.hbm_to_vmem [thread:$0]  %s311_s0, 256, %s18_s23, [#allocation3], %s259_s25, %s259_s25, %s260_s26  }
  0x1a   :  { %s261_s1 = smov [#allocation7]  }
  0x1b   :  { %s44_s29 = sshll.u32 %s261_s1, 4  ;;  %s45_s29 = int_to_ptr.vmem [resolvable:$true] %s44_s29 }
  0x1c   :  { %s217_s30 = scalar_lea.vmem %s45_s29, 128  ;;  %p222_p11 = scmp.lt.s32.totalorder %s45_s29, %s45_s29 }
  0x1d   :  { %p218_p10 = scmp.ne.s32.totalorder %s45_s29, %s217_s30  ;;  %p223_p12 = scmp.lt.s32.totalorder %s217_s30, %s217_s30 }
  0x1f   :  { %p224_p13 = por %p223_p12, %p222_p11 }
  0x21   :  { %p225_p0 = pnand %p224_p13, %p218_p10 }
  0x23   :  { %228 = shalt.err (!%p225_p0)
}
  0x24   :  { %47 = dma.hbm_to_vmem [thread:$0]  %s314_s3, 128, %s45_s29, [#allocation6]  }
  0x25   :  { %249 = dma.done.wait [#allocation3], 256  }
  0x26   :  { %250 = vsyncadd [#allocation3], 4294967040 }
  0x27   :  { %251 = dma.done.wait [#allocation6], 256  }
  0x28   :  { %252 = vsyncadd [#allocation6], 4294967040  ;;  %v262_v0 = vmov 0.0   ;;  %vm263_vm0 = vmmov 0   ;;  %v168_v1 = vld [vmem:[#allocation5] sm:$0xff]   ;;  %v58_v2 = vld [vmem:[#allocation2] sm:$0xff] }
  0x29   :  { %152 = vmatprep.subr.bf16.mxu0 %v262_v0  ;;  %154 = vmatprep.mubr.msk.bf16.mxu0 %vm263_vm0, %v262_v0  ;;  %v59_v3 = vld [vmem:[#allocation2 + $0x8] sm:$0xff]  ;;  %vm69_vm1 = vcmask 130048   ;;  %v149_v5 = vld [vmem:[%s313_s2] ss:$0 sm:$0xff]  ;;  %v123_v7 = vld [vmem:[#allocation7] sm:$0xff]  ;;  %vm126_vm2 = vcmask 261120  }
  0x2a   :  { %153 = vmatpush3.bf16.msra.mxu0 %v168_v1  ;;  %v60_v4 = vpack.c.bf16 %v59_v3, %v58_v2  ;;  %s264_s3 = smov [#allocation8]  }
  0x2b   :  { %s134_s8 = sshll.u32 %s264_s3, 4  ;;  %s135_s8 = int_to_ptr.vmem [resolvable:$true] %s134_s8 }
  0x2c   :  { %s229_s9 = scalar_lea.vmem %s135_s8, 256  ;;  %p234_p2 = scmp.lt.s32.totalorder %s135_s8, %s135_s8 }
  0x2d   :  { %155 = vmatmul.mubr.msk.bf16.vlgmr.msra.gmra.mxu0 %vm69_vm1, %v60_v4  ;;  %p230_p1 = scmp.ne.s32.totalorder %s135_s8, %s229_s9  ;;  %p235_p3 = scmp.lt.s32.totalorder %s229_s9, %s229_s9 }
  0x2f   :  { %p236_p4 = por %p235_p3, %p234_p2 }
  0x31   :  { %p237_p5 = pnand %p236_p4, %p230_p1 }
  0xed   :  { %v107_v6 = vpop.f32.mrf.mxu0 }
  0xee   :  { %v121_v8 = vadd.f32 %v149_v5, %v107_v6 }
  0xef   :  { %v156_v9 = vpop.f32.mrf.mxu0 }
  0xf0   :  { %v124_v10 = vadd.f32 %v123_v7, %v121_v8 }
  0xf1   :  { %v110_v11 = vpop.f32.mrf.mxu0 }
  0xf2   :  { %v122_v12 = vadd.f32 %v149_v5, %v110_v11  ;;  %127 = vst.msk [vmem:[#allocation8] sm:$0xff] %vm126_vm2, %v124_v10 }
  0xf3   :  { %v157_v13 = vpop.f32.mrf.mxu0 }
  0xf4   :  { %v125_v14 = vadd.f32 %v123_v7, %v122_v12 }
  0xf6   :  { %128 = vst.msk [vmem:[#allocation8 + $0x8] sm:$0xff] %vm126_vm2, %v125_v14 }
  0xf7   :  { %240 = shalt.err (!%p237_p5)
}
  0xf8   :  { %140 = dma.vmem_to_hbm [thread:$0]  %s135_s8, 256, %s315_s4, [#allocation4], %s259_s25, %s259_s25, %s260_s26  }
  0xf9   :  { %253 = dma.done.wait [#allocation4], 256  }
  0xfa   :  { %254 = vsyncadd [#allocation4], 4294967040 }
  0xfb   :  { %144 = vsyncpa [#allocation3], 1 }
  0xfc   :  { %145 = vsyncpa [#allocation6], 1 }
  0xfd   :  { %146 = vsyncpa [#allocation4], 1 }

</bundles_post_ra>
